<compile_context>
chip_gen: v5e
topology: v5e:2x2
jax: 0.10.0
libtpu: 0.0.40
codegen_flags: <defaults>
</compile_context>

<pallas_src>
import jax
import jax.numpy as jnp
from jax.experimental import pallas as pl
from jax.experimental.pallas import tpu as pltpu  # noqa: F401  (TPU backend)


def _fused_attention_kernel(xq_ref, xk_ref, xv_ref, amask_ref, scale_ref,
                            wq_ref, bq_ref, wk_ref, bk_ref, wv_ref, bv_ref,
                            out_ref):
    G, S, Hh = out_ref.shape  # G = B*H groups, S seq, Hh head-proj width

    # --- Batched, head-shared linear projections (one fat matmul each) -----
    q = jnp.dot(xq_ref[...], wq_ref[...],
                preferred_element_type=jnp.float32) + bq_ref[...]   # (G*S, Hh)
    k = jnp.dot(xk_ref[...], wk_ref[...],
                preferred_element_type=jnp.float32) + bk_ref[...]   # (G*S, Hh)
    v = jnp.dot(xv_ref[...], wv_ref[...],
                preferred_element_type=jnp.float32) + bv_ref[...]   # (G*S, Hh)

    # --- Fold 1/inv_scale_factor into q (EUP reciprocal + VPU multiply) ----
    # scale_ref is (G*S, 1): the per-head inv_scale broadcast per row.
    q = q * pl.reciprocal(scale_ref[...], approx=False)

    # Tile-aligned reshapes back to (group, seq, feature).
    q = q.reshape(G, S, Hh)
    k = k.reshape(G, S, Hh)
    v = v.reshape(G, S, Hh)

    # --- Scores: contract the feature dim, no explicit k transpose ---------
    s = jnp.einsum('gse,gte->gst', q, k,
                   preferred_element_type=jnp.float32)              # (G, S, S)

    # Additive attention mask (0 keep / -1e9 masked), precomputed in wrapper.
    s = s + amask_ref[...]

    # --- Row-wise softmax ---------------------------------------------------
    row_max = jnp.max(s, axis=-1, keepdims=True)
    e = jnp.exp(s - row_max)
    denom = jnp.sum(e, axis=-1, keepdims=True)
    p = e * pl.reciprocal(denom, approx=False)

    # TODO(synk): F.dropout(p=1.0, training=True) in the original module would
    # zero the entire output; we keep deterministic inference semantics
    # (dropout = identity).

    out = jnp.einsum('gst,gte->gse', p, v,
                     preferred_element_type=jnp.float32)             # (G, S, Hh)
    out_ref[...] = out.astype(out_ref.dtype)


def attention_model(query, key, value, mask,
                    wq, bq, wk, bk, wv, bv, inv_scale_factor):
    """query/key/value: (B, H, S, E); mask: (B, H, S, S);
    w*: (E, Hh); b*: (1, Hh); inv_scale_factor: (1, H, 1, 1)."""
    B, H, S, E = query.shape
    Hh = wq.shape[1]
    G = B * H

    # Layout plumbing only (pure reshapes / tiny parameter broadcast):
    xq = query.reshape(G * S, E)
    xk = key.reshape(G * S, E)
    xv = value.reshape(G * S, E)

    # TODO(synk): `mask.fill_attention_mask` is not a standard torch op; we use
    # the conventional additive-attention-mask semantics (masked -> -1e9).
    amask = ((mask - 1.0) * 1e9).astype(jnp.float32).reshape(G, S, S)

    # Per-row inv_scale (per-head value broadcast over the seq dimension).
    scale_rows = jnp.broadcast_to(
        inv_scale_factor.reshape(1, H, 1, 1).astype(jnp.float32),
        (B, H, S, 1)).reshape(G * S, 1)

    # Single invocation, no grid: every array is a full-block VMEM ref.
    out = pl.pallas_call(
        _fused_attention_kernel,
        out_shape=jax.ShapeDtypeStruct((G, S, Hh), jnp.float32),
    )(xq, xk, xv, amask, scale_rows, wq, bq, wk, bk, wv, bv)

    return out.reshape(B, H, S, Hh)


def _reference(query, key, value, mask, wq, bq, wk, bk, wv, bv, inv_scale):
    q = query @ wq + bq
    k = key @ wk + bk
    v = value @ wv + bv
    qk = jnp.einsum("bhse,bhte->bhst", q, k)
    scaled = qk / inv_scale
    scaled = scaled + (mask - 1.0) * 1e9      # additive attention mask
    p = jax.nn.softmax(scaled, axis=-1)
    return jnp.einsum("bhst,bhte->bhse", p, v)


if __name__ == "__main__":
    # Small shapes consistent with the module's forward pass.
    B, num_heads, S, E = 2, 4, 8, 16   # input_embedding_size = E = 16

    root = jax.random.PRNGKey(0)
    keys = jax.random.split(root, 8)

    query = jax.random.normal(keys[0], (B, num_heads, S, E), dtype=jnp.float32)
    key_t = jax.random.normal(keys[1], (B, num_heads, S, E), dtype=jnp.float32)
    value = jax.random.normal(keys[2], (B, num_heads, S, E), dtype=jnp.float32)
    # Binary attention mask: 1.0 = keep, 0.0 = masked out.
    mask = (jax.random.uniform(keys[3], (B, num_heads, S, S)) > 0.25
            ).astype(jnp.float32)

    # Deterministic Linear(E -> num_heads) parameters (PyTorch-style uniform
    # bound 1/sqrt(E)).  Weights stored pre-transposed as (E, num_heads).
    bound = 1.0 / (E ** 0.5)
    wq = jax.random.uniform(keys[4], (E, num_heads), minval=-bound, maxval=bound)
    wk = jax.random.uniform(keys[5], (E, num_heads), minval=-bound, maxval=bound)
    wv = jax.random.uniform(keys[6], (E, num_heads), minval=-bound, maxval=bound)
    bq = jax.random.uniform(keys[7], (1, num_heads), minval=-bound, maxval=bound)
    bk = bq * 0.5
    bv = bq * 0.25

    # TODO(synk): the PyTorch module initializes inv_scale_factor to zeros,
    # which makes `qk / inv_scale_factor` non-finite; we use a deterministic
    # nonzero value (sqrt(num_heads)) so the kernel output is meaningful.
    inv_scale = jnp.full((1, num_heads, 1, 1), float(num_heads) ** 0.5,
                         dtype=jnp.float32)

    out = attention_model(query, key_t, value, mask,
                          wq, bq, wk, bk, wv, bv, inv_scale)
    out = jax.block_until_ready(out)

    ref = _reference(query, key_t, value, mask, wq, bq, wk, bk, wv, bv,
                     inv_scale)
    assert out.shape == (B, num_heads, S, num_heads)
    assert jnp.allclose(out, ref, atol=2e-5, rtol=2e-5)

    print("KERNEL_OK")
</pallas_src>

<mosaic_0001>
module attributes {stable_mosaic.version = 11 : i64} {
  func.func @_fused_attention_kernel(%arg0: memref<64x16xf32, #tpu.memory_space<vmem>>, %arg1: memref<64x16xf32, #tpu.memory_space<vmem>>, %arg2: memref<64x16xf32, #tpu.memory_space<vmem>>, %arg3: memref<8x8x8xf32, #tpu.memory_space<vmem>>, %arg4: memref<64x1xf32, #tpu.memory_space<vmem>>, %arg5: memref<16x4xf32, #tpu.memory_space<vmem>>, %arg6: memref<1x4xf32, #tpu.memory_space<vmem>>, %arg7: memref<16x4xf32, #tpu.memory_space<vmem>>, %arg8: memref<1x4xf32, #tpu.memory_space<vmem>>, %arg9: memref<16x4xf32, #tpu.memory_space<vmem>>, %arg10: memref<1x4xf32, #tpu.memory_space<vmem>>, %arg11: memref<8x8x4xf32, #tpu.memory_space<vmem>>) attributes {dimension_semantics = [], scalar_prefetch = 0 : i64, scratch_operands = 0 : i64, tpu.core_type = #tpu.core_type<tc>} {
    %c0 = arith.constant 0 : index
    %c0_0 = arith.constant 0 : index
    %0 = vector.load %arg0[%c0, %c0_0] : memref<64x16xf32, #tpu.memory_space<vmem>>, vector<64x16xf32>
    %c0_1 = arith.constant 0 : index
    %c0_2 = arith.constant 0 : index
    %1 = vector.load %arg5[%c0_1, %c0_2] : memref<16x4xf32, #tpu.memory_space<vmem>>, vector<16x4xf32>
    %cst = arith.constant dense<0.000000e+00> : vector<64x4xf32>
    %2 = tpu.matmul %0, %1, %cst {dimension_numbers = #tpu.dot_dimension_numbers<[1], [0], [0], [1], [0, 0, 1, 1], [], []>} : vector<64x16xf32>, vector<16x4xf32>, vector<64x4xf32> -> vector<64x4xf32>
    %c0_3 = arith.constant 0 : index
    %c0_4 = arith.constant 0 : index
    %3 = vector.load %arg6[%c0_3, %c0_4] : memref<1x4xf32, #tpu.memory_space<vmem>>, vector<1x4xf32>
    %4 = vector.broadcast %3 : vector<1x4xf32> to vector<64x4xf32>
    %5 = arith.addf %2, %4 : vector<64x4xf32>
    %c0_5 = arith.constant 0 : index
    %c0_6 = arith.constant 0 : index
    %6 = vector.load %arg1[%c0_5, %c0_6] : memref<64x16xf32, #tpu.memory_space<vmem>>, vector<64x16xf32>
    %c0_7 = arith.constant 0 : index
    %c0_8 = arith.constant 0 : index
    %7 = vector.load %arg7[%c0_7, %c0_8] : memref<16x4xf32, #tpu.memory_space<vmem>>, vector<16x4xf32>
    %cst_9 = arith.constant dense<0.000000e+00> : vector<64x4xf32>
    %8 = tpu.matmul %6, %7, %cst_9 {dimension_numbers = #tpu.dot_dimension_numbers<[1], [0], [0], [1], [0, 0, 1, 1], [], []>} : vector<64x16xf32>, vector<16x4xf32>, vector<64x4xf32> -> vector<64x4xf32>
    %c0_10 = arith.constant 0 : index
    %c0_11 = arith.constant 0 : index
    %9 = vector.load %arg8[%c0_10, %c0_11] : memref<1x4xf32, #tpu.memory_space<vmem>>, vector<1x4xf32>
    %10 = vector.broadcast %9 : vector<1x4xf32> to vector<64x4xf32>
    %11 = arith.addf %8, %10 : vector<64x4xf32>
    %c0_12 = arith.constant 0 : index
    %c0_13 = arith.constant 0 : index
    %12 = vector.load %arg2[%c0_12, %c0_13] : memref<64x16xf32, #tpu.memory_space<vmem>>, vector<64x16xf32>
    %c0_14 = arith.constant 0 : index
    %c0_15 = arith.constant 0 : index
    %13 = vector.load %arg9[%c0_14, %c0_15] : memref<16x4xf32, #tpu.memory_space<vmem>>, vector<16x4xf32>
    %cst_16 = arith.constant dense<0.000000e+00> : vector<64x4xf32>
    %14 = tpu.matmul %12, %13, %cst_16 {dimension_numbers = #tpu.dot_dimension_numbers<[1], [0], [0], [1], [0, 0, 1, 1], [], []>} : vector<64x16xf32>, vector<16x4xf32>, vector<64x4xf32> -> vector<64x4xf32>
    %c0_17 = arith.constant 0 : index
    %c0_18 = arith.constant 0 : index
    %15 = vector.load %arg10[%c0_17, %c0_18] : memref<1x4xf32, #tpu.memory_space<vmem>>, vector<1x4xf32>
    %16 = vector.broadcast %15 : vector<1x4xf32> to vector<64x4xf32>
    %17 = arith.addf %14, %16 : vector<64x4xf32>
    %c0_19 = arith.constant 0 : index
    %c0_20 = arith.constant 0 : index
    %18 = vector.load %arg4[%c0_19, %c0_20] : memref<64x1xf32, #tpu.memory_space<vmem>>, vector<64x1xf32>
    %19 = tpu.reciprocal %18 : vector<64x1xf32> -> vector<64x1xf32>
    %20 = vector.broadcast %19 : vector<64x1xf32> to vector<64x4xf32>
    %21 = arith.mulf %5, %20 : vector<64x4xf32>
    %22 = vector.shape_cast %21 : vector<64x4xf32> to vector<8x8x4xf32>
    %23 = vector.shape_cast %11 : vector<64x4xf32> to vector<8x8x4xf32>
    %24 = vector.shape_cast %17 : vector<64x4xf32> to vector<8x8x4xf32>
    "tpu.trace_start"() <{level = 10 : i32, message = "gse,gte->gst"}> : () -> ()
    %cst_21 = arith.constant dense<0.000000e+00> : vector<8x8x8xf32>
    %25 = tpu.matmul %22, %23, %cst_21 {dimension_numbers = #tpu.dot_dimension_numbers<[2], [2], [1], [1], [0, 0, 0, 1, 1, 1], [0], [0]>} : vector<8x8x4xf32>, vector<8x8x4xf32>, vector<8x8x8xf32> -> vector<8x8x8xf32>
    "tpu.trace_stop"() : () -> ()
    %c0_22 = arith.constant 0 : index
    %c0_23 = arith.constant 0 : index
    %c0_24 = arith.constant 0 : index
    %26 = vector.load %arg3[%c0_22, %c0_23, %c0_24] : memref<8x8x8xf32, #tpu.memory_space<vmem>>, vector<8x8x8xf32>
    %27 = arith.addf %25, %26 : vector<8x8x8xf32>
    %cst_25 = arith.constant dense<0xFF800000> : vector<8x8xf32>
    %28 = vector.multi_reduction <maximumf>, %27, %cst_25 [2] : vector<8x8x8xf32> to vector<8x8xf32>
    %29 = vector.shape_cast %28 : vector<8x8xf32> to vector<8x8x1xf32>
    %30 = vector.broadcast %29 : vector<8x8x1xf32> to vector<8x8x8xf32>
    %31 = arith.subf %27, %30 : vector<8x8x8xf32>
    %32 = math.exp %31 : vector<8x8x8xf32>
    %cst_26 = arith.constant dense<0.000000e+00> : vector<8x8xf32>
    %33 = vector.multi_reduction <add>, %32, %cst_26 [2] : vector<8x8x8xf32> to vector<8x8xf32>
    %34 = vector.shape_cast %33 : vector<8x8xf32> to vector<8x8x1xf32>
    %35 = tpu.reciprocal %34 : vector<8x8x1xf32> -> vector<8x8x1xf32>
    %36 = vector.broadcast %35 : vector<8x8x1xf32> to vector<8x8x8xf32>
    %37 = arith.mulf %32, %36 : vector<8x8x8xf32>
    "tpu.trace_start"() <{level = 10 : i32, message = "gst,gte->gse"}> : () -> ()
    %cst_27 = arith.constant dense<0.000000e+00> : vector<8x8x4xf32>
    %38 = tpu.matmul %37, %24, %cst_27 {dimension_numbers = #tpu.dot_dimension_numbers<[2], [1], [1], [2], [0, 0, 0, 1, 1, 2], [0], [0]>} : vector<8x8x8xf32>, vector<8x8x4xf32>, vector<8x8x4xf32> -> vector<8x8x4xf32>
    "tpu.trace_stop"() : () -> ()
    %c0_28 = arith.constant 0 : index
    %c0_29 = arith.constant 0 : index
    %c0_30 = arith.constant 0 : index
    %39 = vector.load %arg11[%c0_28, %c0_29, %c0_30] : memref<8x8x4xf32, #tpu.memory_space<vmem>>, vector<8x8x4xf32>
    tpu.vector_store %arg11[%c0_28, %c0_29, %c0_30], %38 {strides = array<i32>} : memref<8x8x4xf32, #tpu.memory_space<vmem>>, vector<8x8x4xf32>,
    return
  }
}

</mosaic_0001>

<bundles_post_ra>
// kernel: tpu_custom_call.1
= control target key start
LH: loop header
LB: loop body
LE: loop exit
PB: predicated region body
PF: predicated region fallthrough
CT: control target
= control target key end

     0   :  { %v1153_v3 = vmov 0   ;;  %vm52_vm0 = vcmask 130048   ;;  %s1632_s5 = inlined_call_operand.vmem [shape: f32[16,4], index: 5, kind: input, shape index: {}]   ;;  %s1633_s7 = inlined_call_operand.vmem [shape: f32[16,4], index: 7, kind: input, shape index: {}]   ;;  %s1634_s0 = inlined_call_operand.vmem [shape: f32[64,16], index: 0, kind: input, shape index: {}]   ;;  %s1635_s1 = inlined_call_operand.vmem [shape: f32[64,16], index: 1, kind: input, shape index: {}]   ;;  %s1636_s4 = inlined_call_operand.vmem [shape: f32[64,1], index: 4, kind: input, shape index: {}]   ;;  %s1637_s6 = inlined_call_operand.vmem [shape: f32[1,4], index: 6, kind: input, shape index: {}]   ;;  %s1638_s8 = inlined_call_operand.vmem [shape: f32[1,4], index: 8, kind: input, shape index: {}]   ;;  %s1639_s3 = inlined_call_operand.vmem [shape: f32[8,8,8], index: 3, kind: input, shape index: {}]   ;;  %s1640_s9 = inlined_call_operand.vmem [shape: f32[16,4], index: 9, kind: input, shape index: {}]   ;;  %s1641_s2 = inlined_call_operand.vmem [shape: f32[64,16], index: 2, kind: input, shape index: {}]   ;;  %s1642_s10 = inlined_call_operand.vmem [shape: f32[1,4], index: 10, kind: input, shape index: {}]   ;;  %s1643_s11 = inlined_call_operand.vmem [shape: f32[8,8,4], index: 11, kind: output, shape index: {}]  }
   0x1   :  { %v47_v0 = vld [vmem:[%s1632_s5 + $0x8] sm:$0xff]  ;;  %v46_v2 = vld [vmem:[%s1632_s5] sm:$0xff]  ;;  %1099 = vset.pattern.permute.xlu0 %v1153_v3  ;;  %1100 = vset.pattern.permute.xlu1 %v1153_v3  ;;  %v278_v8 = vld [vmem:[%s1636_s4 + $0x10] sm:$0xff] }
   0x2   :  { %v127_v1 = vld [vmem:[%s1633_s7 + $0x8] sm:$0xff]  ;;  %91 = vmatpush.msra.mxu0 %v47_v0  ;;  %v126_v4 = vld [vmem:[%s1633_s7] sm:$0xff]  ;;  %1101 = vset.pattern.permute.xlu2 %v1153_v3  ;;  %v1249_v10 = vld [vmem:[%s1636_s4 + $0x18] sm:$0xff]  ;;  %v321_v18 = vand.u32 2147483647, %v278_v8  ;;  %v323_v19 = vand.u32 2147483648, %v278_v8  ;;  %vm317_vm3 = vweird.f32 %v278_v8 }
   0x3   :  { %170 = vmatpush.msra.mxu1 %v127_v1  ;;  %v38_v5 = vld [vmem:[%s1634_s0] sm:$0xff]  ;;  %v1243_v9 = vld [vmem:[%s1636_s4 + $0x8] sm:$0xff]  ;;  %v1254_v11 = vld [vmem:[%s1636_s4 + $0x30] sm:$0xff]  ;;  %vm331_vm9 = vweird.f32 %v1249_v10  ;;  %v337_v48 = vand.u32 2147483648, %v1249_v10  ;;  %v335_v58 = vand.u32 2147483647, %v1249_v10 }
   0x4   :  { %v118_v6 = vld [vmem:[%s1635_s1] sm:$0xff]  ;;  %92 = vmatpush.msra.mxu0 %v46_v2  ;;  %v1260_v14 = vld [vmem:[%s1636_s4 + $0x38] sm:$0xff]  ;;  %v39_v16 = vld [vmem:[%s1634_s0 + $0x8] sm:$0xff]  ;;  %vm303_vm5 = vweird.f32 %v1243_v9  ;;  %vm1283_vm7 = vcmp.eq.f32.partialorder %v321_v18, 8.507059e+37  ;;  %v324_v31 = vor.u32 1.1754944e-38, %v323_v19  ;;  %v309_v39 = vand.u32 2147483648, %v1243_v9 }
   0x5   :  { %v276_v7 = vld [vmem:[%s1636_s4] sm:$0xff]  ;;  %171 = vmatpush.msra.mxu1 %v126_v4  ;;  %1050 = vmatmul.msk.f32.vlgmr.msra.gmra.mxu0 %vm52_vm0, %v38_v5  ;;  %v119_v17 = vld [vmem:[%s1635_s1 + $0x8] sm:$0xff]  ;;  %v307_v35 = vand.u32 2147483647, %v1243_v9  ;;  %v40_v46 = vld [vmem:[%s1634_s0 + $0x10] sm:$0xff]  ;;  %v338_v2 = vor.u32 1.1754944e-38, %v337_v48 }
   0x6   :  { %1105 = vrcp.f32 %v276_v7  ;;  %1058 = vmatmul.msk.f32.vlgmr.msra.gmra.mxu1 %vm52_vm0, %v118_v6  ;;  %v293_v12 = vand.u32 2147483647, %v276_v7  ;;  %v295_v13 = vand.u32 2147483648, %v276_v7  ;;  %vm289_vm1 = vweird.f32 %v276_v7  ;;  %v120_v51 = vld [vmem:[%s1635_s1 + $0x10] sm:$0xff]  ;;  %v280_v60 = vld [vmem:[%s1636_s4 + $0x20] sm:$0xff] }
   0x7   :  { %1107 = vrcp.f32 %v278_v8  ;;  %v310_v0 = vor.u32 1.1754944e-38, %v309_v39  ;;  %vm308_vm15 = vcmp.eq.f32.partialorder %v307_v35, 8.507059e+37  ;;  %v379_v6 = vand.u32 2147483648, %v1254_v11 }
   0x8   :  { %1109 = vrcp.f32 %v1243_v9  ;;  %vm1272_vm2 = vcmp.eq.f32.partialorder %v293_v12, 8.507059e+37  ;;  %v296_v24 = vor.u32 1.1754944e-38, %v295_v13  ;;  %v391_v19 = vand.u32 2147483647, %v1260_v14 }
   0x9   :  { %1111 = vrcp.f32 %v1249_v10 }
   0xa   :  { %1113 = vrcp.f32 %v1254_v11 }
   0xb   :  { %1115 = vrcp.f32 %v1260_v14 }
   0xc   :  { %v1106_v15 = vpop.eup %1105  ;;  %1117 = vrcp.f32 %v280_v60 }
   0xd   :  { %v1108_v20 = vpop.eup %1107  ;;  %v285_v21 = vmul.f32 %v1106_v15, %v276_v7  ;;  %1051 = vmatmul.msk.f32.gmra.mxu0 %vm52_vm0, %v39_v16  ;;  %vm290_vm4 = vweird.f32 %v1106_v15  ;;  %v393_v16 = vand.u32 2147483648, %v1260_v14 }
   0xe   :  { %v1270_v22 = vpop.eup %1109  ;;  %v313_v25 = vmul.f32 %v1108_v20, %v278_v8  ;;  %1059 = vmatmul.msk.f32.gmra.mxu1 %vm52_vm0, %v119_v17  ;;  %vm318_vm6 = vweird.f32 %v1108_v20  ;;  %vm1293_vm8 = vmor %vm289_vm1, %vm290_vm4  ;;  %vm336_vm1 = vcmp.eq.f32.partialorder %v335_v58, 8.507059e+37  ;;  %v41_v8 = vld [vmem:[%s1634_s0 + $0x18] sm:$0xff]  ;;  %vm387_vm4 = vweird.f32 %v1260_v14 }
   0xf   :  { %v286_v26 = vsub.f32 1.0, %v285_v21  ;;  %v299_v27 = vmul.f32 %v1270_v22, %v1243_v9  ;;  %v1281_v28 = vpop.eup %1111  ;;  %vm1305_vm10 = vmor %vm317_vm3, %vm318_vm6  ;;  %vm304_vm11 = vweird.f32 %v1270_v22  ;;  %v281_v21 = vld [vmem:[%s1636_s4 + $0x28] sm:$0xff] }
  0x10   :  { %v314_v29 = vsub.f32 1.0, %v313_v25  ;;  %v1287_v32 = vpop.eup %1113  ;;  %v327_v36 = vmul.f32 %v1281_v28, %v1249_v10  ;;  %vm332_vm12 = vweird.f32 %v1281_v28  ;;  %vm1331_vm13 = vmor %vm303_vm5, %vm304_vm11  ;;  %v121_v10 = vld [vmem:[%s1635_s1 + $0x18] sm:$0xff]  ;;  %1119 = vrcp.f32 %v281_v21 }
  0x11   :  { %v287_v33 = vmul.f32 %v1106_v15, %v286_v26  ;;  %v300_v34 = vsub.f32 1.0, %v299_v27  ;;  %v369_v40 = vmul.f32 %v1287_v32, %v1254_v11  ;;  %v1301_v41 = vpop.eup %1115  ;;  %vm1347_vm14 = vmor %vm331_vm9, %vm332_vm12  ;;  %vm374_vm3 = vweird.f32 %v1287_v32 }
  0x12   :  { %v315_v38 = vmul.f32 %v1108_v20, %v314_v29  ;;  %v328_v45 = vsub.f32 1.0, %v327_v36  ;;  %v383_v49 = vmul.f32 %v1301_v41, %v1260_v14  ;;  %vm388_vm5 = vweird.f32 %v1301_v41  ;;  %v1118_v9 = vpop.eup %1117 }
  0x13   :  { %v288_v42 = vadd.f32 %v1106_v15, %v287_v33  ;;  %v301_v44 = vmul.f32 %v1270_v22, %v300_v34  ;;  %v370_v54 = vsub.f32 1.0, %v369_v40  ;;  %vm346_vm9 = vweird.f32 %v1118_v9 }
  0x14   :  { %v316_v47 = vadd.f32 %v1108_v20, %v315_v38  ;;  %v329_v53 = vmul.f32 %v1281_v28, %v328_v45  ;;  %v384_v59 = vsub.f32 1.0, %v383_v49  ;;  %v394_v26 = vor.u32 1.1754944e-38, %v393_v16  ;;  %v44_v49 = vld [vmem:[%s1634_s0 + $0x30] sm:$0xff] }
  0x15   :  { %v292_v50 = vsel %vm1293_vm8, %v1106_v15, %v288_v42  ;;  %v302_v52 = vadd.f32 %v1270_v22, %v301_v44  ;;  %1052 = vmatmul.msk.f32.gmra.mxu0 %vm52_vm0, %v40_v46  ;;  %v371_v3 = vmul.f32 %v1287_v32, %v370_v54  ;;  %v377_v15 = vand.u32 2147483647, %v1254_v11  ;;  %v43_v44 = vld [vmem:[%s1634_s0 + $0x28] sm:$0xff]  ;;  %v1102_v54 = vld [vmem:[%s1637_s6] ss:$0 sm:$0xff] }
  0x16   :  { %v297_v55 = vsel %vm1272_vm2, %v296_v24, %v292_v50  ;;  %v320_v56 = vsel %vm1305_vm10, %v1108_v20, %v316_v47  ;;  %v330_v62 = vadd.f32 %v1281_v28, %v329_v53  ;;  %1060 = vmatmul.msk.f32.gmra.mxu1 %vm52_vm0, %v120_v51  ;;  %v385_v5 = vmul.f32 %v1301_v41, %v384_v59  ;;  %v1120_v34 = vpop.eup %1119  ;;  %v123_v46 = vld [vmem:[%s1635_s1 + $0x28] sm:$0xff]  ;;  %v124_v50 = vld [vmem:[%s1635_s1 + $0x30] sm:$0xff]  ;;  %v45_v51 = vld [vmem:[%s1634_s0 + $0x38] sm:$0xff] }
  0x17   :  { %398 = vperm.xlu0 %1099, %v297_v55   ;;  %v325_v61 = vsel %vm1283_vm7, %v324_v31, %v320_v56  ;;  %v306_v1 = vsel %vm1331_vm13, %v1270_v22, %v302_v52  ;;  %vm373_vm2 = vweird.f32 %v1254_v11  ;;  %v372_v13 = vadd.f32 %v1287_v32, %v371_v3  ;;  %vm1388_vm7 = vmor %vm387_vm4, %vm388_vm5  ;;  %v42_v31 = vld [vmem:[%s1634_s0 + $0x20] sm:$0xff]  ;;  %v125_v52 = vld [vmem:[%s1635_s1 + $0x38] sm:$0xff] }
  0x18   :  { %408 = vperm.xlu1 %1100, %v325_v61   ;;  %v334_v4 = vsel %vm1347_vm14, %v1281_v28, %v330_v62  ;;  %v311_v7 = vsel %vm308_vm15, %v310_v0, %v306_v1  ;;  %vm1374_vm6 = vmor %vm373_vm2, %vm374_vm3  ;;  %v386_v18 = vadd.f32 %v1301_v41, %v385_v5  ;;  %v341_v20 = vmul.f32 %v1118_v9, %v280_v60  ;;  %v1103_v53 = vld [vmem:[%s1638_s8] ss:$0 sm:$0xff] }
  0x19   :  { %v339_v12 = vsel %vm336_vm1, %v338_v2, %v334_v4  ;;  %v380_v22 = vor.u32 1.1754944e-38, %v379_v6  ;;  %vm345_vm8 = vweird.f32 %v280_v60  ;;  %v349_v24 = vand.u32 2147483647, %v280_v60 }
  0x1a   :  { %v342_v23 = vsub.f32 1.0, %v341_v20  ;;  %v376_v25 = vsel %vm1374_vm6, %v1287_v32, %v372_v13  ;;  %vm378_vm10 = vcmp.eq.f32.partialorder %v377_v15, 8.507059e+37  ;;  %v351_v27 = vand.u32 2147483648, %v280_v60  ;;  %vm347_vm12 = vmor %vm345_vm8, %vm346_vm9  ;;  %v122_v32 = vld [vmem:[%s1635_s1 + $0x20] sm:$0xff] }
  0x1b   :  { %v390_v14 = vsel %vm1388_vm7, %v1301_v41, %v386_v18  ;;  %vm392_vm11 = vcmp.eq.f32.partialorder %v391_v19, 8.507059e+37  ;;  %v381_v30 = vsel %vm378_vm10, %v380_v22, %v376_v25  ;;  %vm350_vm13 = vcmp.eq.f32.partialorder %v349_v24, 8.507059e+37 }
  0x1c   :  { %v343_v28 = vmul.f32 %v1118_v9, %v342_v23  ;;  %v352_v29 = vor.u32 1.1754944e-38, %v351_v27  ;;  %v395_v35 = vsel %vm392_vm11, %v394_v26, %v390_v14  ;;  %v355_v37 = vmul.f32 %v1120_v34, %v281_v21 }
  0x1d   :  { %1053 = vmatmul.msk.f32.gmra.mxu0 %vm52_vm0, %v41_v8  ;;  %v365_v39 = vand.u32 2147483648, %v281_v21  ;;  %vm359_vm14 = vweird.f32 %v281_v21  ;;  %vm360_vm15 = vweird.f32 %v1120_v34  ;;  %v363_v41 = vand.u32 2147483647, %v281_v21 }
  0x1e   :  { %1061 = vmatmul.msk.f32.gmra.mxu1 %vm52_vm0, %v121_v10  ;;  %v344_v33 = vadd.f32 %v1118_v9, %v343_v28  ;;  %v356_v40 = vsub.f32 1.0, %v355_v37  ;;  %vm361_vm1 = vmor %vm359_vm14, %vm360_vm15  ;;  %vm452_vm3 = vcmask 31744   ;;  %vm661_vm4 = vcmask 64512  }
  0x1f   :  { %403 = vperm.xlu0 %1099, %v311_v7   ;;  %v366_v43 = vor.u32 1.1754944e-38, %v365_v39  ;;  %vm364_vm2 = vcmp.eq.f32.partialorder %v363_v41, 8.507059e+37  ;;  %v444_v39 = vld [vmem:[%s1639_s3] sm:$0xff] }
  0x20   :  { %413 = vperm.xlu1 %1100, %v339_v12   ;;  %v348_v36 = vsel %vm347_vm12, %v1118_v9, %v344_v33  ;;  %v357_v42 = vmul.f32 %v1120_v34, %v356_v40 }
  0x21   :  { %v353_v38 = vsel %vm350_vm13, %v352_v29, %v348_v36 }
  0x22   :  { %418 = vperm.xlu2 %1101, %v353_v38   ;;  %v358_v45 = vadd.f32 %v1120_v34, %v357_v42 }
  0x24   :  { %v362_v47 = vsel %vm361_vm1, %v1120_v34, %v358_v45 }
  0x25   :  { %1054 = vmatmul.msk.f32.gmra.mxu0 %vm52_vm0, %v42_v31  ;;  %v367_v48 = vsel %vm364_vm2, %v366_v43, %v362_v47  ;;  %v445_v43 = vld [vmem:[%s1639_s3 + $0x8] sm:$0xff]  ;;  %v446_v47 = vld [vmem:[%s1639_s3 + $0x10] sm:$0xff] }
  0x26   :  { %1062 = vmatmul.msk.f32.gmra.mxu1 %vm52_vm0, %v122_v32 }
  0x27   :  { %428 = vperm.xlu0 %1099, %v381_v30  }
  0x28   :  { %433 = vperm.xlu1 %1100, %v395_v35  }
  0x2a   :  { %423 = vperm.xlu2 %1101, %v367_v48  }
  0x2d   :  { %1055 = vmatmul.msk.f32.gmra.mxu0 %vm52_vm0, %v43_v44 }
  0x2e   :  { %1063 = vmatmul.msk.f32.gmra.mxu1 %vm52_vm0, %v123_v46 }
  0x35   :  { %1056 = vmatmul.msk.f32.gmra.mxu0 %vm52_vm0, %v44_v49 }
  0x36   :  { %1064 = vmatmul.msk.f32.gmra.mxu1 %vm52_vm0, %v124_v50 }
  0x3d   :  { %1057 = vmatmul.msk.f32.gmra.mxu0 %vm52_vm0, %v45_v51  ;;  %v447_v51 = vld [vmem:[%s1639_s3 + $0x18] sm:$0xff] }
  0x3e   :  { %1065 = vmatmul.msk.f32.gmra.mxu1 %vm52_vm0, %v125_v52 }
  0x7c   :  { %v419_v18 = vpop.permute.xlu2 %418 }
  0x82   :  { %v94_v55 = vpop.f32.mrf.mxu0 }
  0x83   :  { %v173_v56 = vpop.f32.mrf.mxu1  ;;  %v95_v58 = vadd.f32 %v1102_v54, %v94_v55  ;;  %v206_v55 = vld [vmem:[%s1640_s9 + $0x8] sm:$0xff] }
  0x84   :  { %v174_v57 = vadd.f32 %v1103_v53, %v173_v56  ;;  %v424_v26 = vpop.permute.xlu2 %423  ;;  %v205_v56 = vld [vmem:[%s1640_s9] sm:$0xff]  ;;  %249 = vmatpush.msra.mxu2 %v206_v55 }
  0x86   :  { %1074 = vmatpush.xpose.msk.msra.mxu3 %vm452_vm3, %v174_v57  ;;  %v197_v57 = vld [vmem:[%s1641_s2] sm:$0xff]  ;;  %250 = vmatpush.msra.mxu2 %v205_v56 }
  0x87   :  { %1066 = vmatmul.msk.f32.vlgmr.msra.gmra.mxu2 %vm52_vm0, %v197_v57 }
  0x89   :  { %v399_v59 = vpop.permute.xlu0 %398 }
  0x8a   :  { %v436_v60 = vmul.f32 %v399_v59, %v95_v58  ;;  %v97_v61 = vpop.f32.mrf.mxu0  ;;  %v409_v4 = vpop.permute.xlu1 %408  ;;  %v448_v58 = vld [vmem:[%s1639_s3 + $0x20] sm:$0xff] }
  0x8b   :  { %v176_v62 = vpop.f32.mrf.mxu1  ;;  %v98_v0 = vadd.f32 %v1102_v54, %v97_v61 }
  0x8c   :  { %1075 = vmatmul.msk.f32.vlgmr.msra.gmra.mxu3 %vm452_vm3, %v436_v60  ;;  %v177_v63 = vadd.f32 %v1103_v53, %v176_v62  ;;  %v198_v62 = vld [vmem:[%s1641_s2 + $0x8] sm:$0xff] }
  0x8e   :  { %1076 = vmatpush.xpose.msk.msrb.mxu3 %vm452_vm3, %v177_v63 }
  0x8f   :  { %1067 = vmatmul.msk.f32.gmra.mxu2 %vm52_vm0, %v198_v62 }
  0x91   :  { %v404_v1 = vpop.permute.xlu0 %403 }
  0x92   :  { %v437_v2 = vmul.f32 %v404_v1, %v98_v0  ;;  %v100_v3 = vpop.f32.mrf.mxu0  ;;  %v414_v15 = vpop.permute.xlu1 %413  ;;  %v450_v0 = vld [vmem:[%s1639_s3 + $0x30] sm:$0xff] }
  0x93   :  { %v101_v5 = vadd.f32 %v1102_v54, %v100_v3  ;;  %v179_v6 = vpop.f32.mrf.mxu1 }
  0x94   :  { %1077 = vmatmul.msk.f32.vlgmr.msrb.gmra.mxu3 %vm452_vm3, %v437_v2  ;;  %v180_v7 = vadd.f32 %v1103_v53, %v179_v6 }
  0x95   :  { %v438_v8 = vmul.f32 %v409_v4, %v101_v5  ;;  %v449_v4 = vld [vmem:[%s1639_s3 + $0x28] sm:$0xff]  ;;  %v451_v5 = vld [vmem:[%s1639_s3 + $0x38] sm:$0xff] }
  0x96   :  { %1078 = vmatpush.xpose.msk.msra.mxu3 %vm452_vm3, %v180_v7 }
  0x99   :  { %v429_v31 = vpop.permute.xlu0 %428 }
  0x9a   :  { %v103_v9 = vpop.f32.mrf.mxu0  ;;  %v434_v37 = vpop.permute.xlu1 %433 }
  0x9b   :  { %v104_v10 = vadd.f32 %v1102_v54, %v103_v9  ;;  %v182_v12 = vpop.f32.mrf.mxu1 }
  0x9c   :  { %1079 = vmatmul.msk.f32.vlgmr.msra.gmra.mxu3 %vm452_vm3, %v438_v8  ;;  %v183_v13 = vadd.f32 %v1103_v53, %v182_v12  ;;  %v199_v12 = vld [vmem:[%s1641_s2 + $0x10] sm:$0xff] }
  0x9d   :  { %v439_v16 = vmul.f32 %v414_v15, %v104_v10  ;;  %1068 = vmatmul.msk.f32.gmra.mxu2 %vm52_vm0, %v199_v12 }
  0x9e   :  { %1080 = vmatpush.xpose.msk.msrb.mxu3 %vm452_vm3, %v183_v13 }
  0xa2   :  { %v106_v17 = vpop.f32.mrf.mxu0 }
  0xa3   :  { %v107_v19 = vadd.f32 %v1102_v54, %v106_v17  ;;  %v185_v20 = vpop.f32.mrf.mxu1  ;;  %v200_v17 = vld [vmem:[%s1641_s2 + $0x18] sm:$0xff] }
  0xa4   :  { %1081 = vmatmul.msk.f32.vlgmr.msrb.gmra.mxu3 %vm452_vm3, %v439_v16  ;;  %v186_v21 = vadd.f32 %v1103_v53, %v185_v20  ;;  %v201_v20 = vld [vmem:[%s1641_s2 + $0x20] sm:$0xff] }
  0xa5   :  { %v440_v22 = vmul.f32 %v419_v18, %v107_v19  ;;  %1069 = vmatmul.msk.f32.gmra.mxu2 %vm52_vm0, %v200_v17 }
  0xa6   :  { %1082 = vmatpush.xpose.msk.msra.mxu3 %vm452_vm3, %v186_v21 }
  0xaa   :  { %v109_v11 = vpop.f32.mrf.mxu0 }
  0xab   :  { %v110_v23 = vadd.f32 %v1102_v54, %v109_v11  ;;  %v188_v24 = vpop.f32.mrf.mxu1 }
  0xac   :  { %1083 = vmatmul.msk.f32.vlgmr.msra.gmra.mxu3 %vm452_vm3, %v440_v22  ;;  %v189_v25 = vadd.f32 %v1103_v53, %v188_v24 }
  0xad   :  { %v441_v27 = vmul.f32 %v424_v26, %v110_v23  ;;  %1070 = vmatmul.msk.f32.gmra.mxu2 %vm52_vm0, %v201_v20 }
  0xae   :  { %1084 = vmatpush.xpose.msk.msrb.mxu3 %vm452_vm3, %v189_v25  ;;  %v202_v25 = vld [vmem:[%s1641_s2 + $0x28] sm:$0xff] }
  0xb2   :  { %v112_v14 = vpop.f32.mrf.mxu0 }
  0xb3   :  { %v113_v28 = vadd.f32 %v1102_v54, %v112_v14  ;;  %v191_v29 = vpop.f32.mrf.mxu1 }
  0xb4   :  { %1085 = vmatmul.msk.f32.vlgmr.msrb.gmra.mxu3 %vm452_vm3, %v441_v27  ;;  %v192_v30 = vadd.f32 %v1103_v53, %v191_v29 }
  0xb5   :  { %v442_v33 = vmul.f32 %v429_v31, %v113_v28  ;;  %1071 = vmatmul.msk.f32.gmra.mxu2 %vm52_vm0, %v202_v25  ;;  %v203_v31 = vld [vmem:[%s1641_s2 + $0x30] sm:$0xff] }
  0xb6   :  { %1086 = vmatpush.xpose.msk.msra.mxu3 %vm452_vm3, %v192_v30 }
  0xba   :  { %v115_v34 = vpop.f32.mrf.mxu0 }
  0xbb   :  { %v116_v32 = vadd.f32 %v1102_v54, %v115_v34  ;;  %v194_v35 = vpop.f32.mrf.mxu1 }
  0xbc   :  { %1087 = vmatmul.msk.f32.vlgmr.msra.gmra.mxu3 %vm452_vm3, %v442_v33  ;;  %v195_v36 = vadd.f32 %v1103_v53, %v194_v35 }
  0xbd   :  { %v443_v38 = vmul.f32 %v434_v37, %v116_v32  ;;  %1072 = vmatmul.msk.f32.gmra.mxu2 %vm52_vm0, %v203_v31  ;;  %v204_v37 = vld [vmem:[%s1641_s2 + $0x38] sm:$0xff] }
  0xbe   :  { %1088 = vmatpush.xpose.msk.msrb.mxu3 %vm452_vm3, %v195_v36 }
  0xc4   :  { %1089 = vmatmul.msk.f32.vlgmr.msrb.gmra.mxu3 %vm452_vm3, %v443_v38 }
  0xc5   :  { %1073 = vmatmul.msk.f32.gmra.mxu2 %vm52_vm0, %v204_v37 }
 0x10f   :  { %v476_v40 = vpop.f32.mrf.mxu3 }
 0x110   :  { %v477_v41 = vadd.f32 %v476_v40, %v444_v39  ;;  %v1555_v40 = vld [vmem:[%s1642_s10] ss:$0 sm:$0xff] }
 0x112   :  { %v662_v42 = vsel %vm661_vm4, %v477_v41, -inf }
 0x113   :  { %663 = vmax.xlane.f32.xlu1 %v662_v42 }
 0x117   :  { %v502_v44 = vpop.f32.mrf.mxu3 }
 0x118   :  { %v1460_v45 = vadd.f32 %v502_v44, %v445_v43  ;;  %v252_v43 = vpop.f32.mrf.mxu2 }
 0x119   :  { %v253_v44 = vadd.f32 %v1555_v40, %v252_v43 }
 0x11a   :  { %v665_v46 = vsel %vm661_vm4, %v1460_v45, -inf }
 0x11b   :  { %666 = vmax.xlane.f32.xlu2 %v665_v46  ;;  %872 = vmatpush.msrb.mxu0 %v253_v44 }
 0x11f   :  { %v528_v48 = vpop.f32.mrf.mxu3 }
 0x120   :  { %v529_v49 = vadd.f32 %v528_v48, %v446_v47  ;;  %v255_v48 = vpop.f32.mrf.mxu2 }
 0x122   :  { %v668_v50 = vsel %vm661_vm4, %v529_v49, -inf }
 0x123   :  { %669 = vmax.xlane.f32.xlu2 %v668_v50 }
 0x127   :  { %v554_v52 = vpop.f32.mrf.mxu3 }
 0x128   :  { %v555_v53 = vadd.f32 %v554_v52, %v447_v51  ;;  %v258_v62 = vpop.f32.mrf.mxu2 }
 0x12a   :  { %v671_v54 = vsel %vm661_vm4, %v555_v53, -inf }
 0x12b   :  { %672 = vmax.xlane.f32.xlu0 %v671_v54 }
 0x12f   :  { %v580_v59 = vpop.f32.mrf.mxu3 }
 0x130   :  { %v581_v60 = vadd.f32 %v580_v59, %v448_v58 }
 0x132   :  { %v674_v61 = vsel %vm661_vm4, %v581_v60, -inf }
 0x133   :  { %675 = vmax.xlane.f32.xlu1 %v674_v61 }
 0x137   :  { %v606_v63 = vpop.f32.mrf.mxu3 }
 0x138   :  { %v1503_v6 = vadd.f32 %v606_v63, %v449_v4  ;;  %v259_v63 = vadd.f32 %v1555_v40, %v258_v62  ;;  %v261_v4 = vpop.f32.mrf.mxu2 }
 0x13a   :  { %v677_v10 = vsel %vm661_vm4, %v1503_v6, -inf  ;;  %918 = vmatpush.msrb.mxu2 %v259_v63 }
 0x13f   :  { %v632_v1 = vpop.f32.mrf.mxu3 }
 0x140   :  { %v1493_v2 = vadd.f32 %v632_v1, %v450_v0 }
 0x142   :  { %v680_v3 = vsel %vm661_vm4, %v1493_v2, -inf }
 0x143   :  { %681 = vmax.xlane.f32.xlu2 %v680_v3 }
 0x147   :  { %v658_v7 = vpop.f32.mrf.mxu3 }
 0x148   :  { %v1505_v8 = vadd.f32 %v658_v7, %v451_v5  ;;  %v262_v5 = vadd.f32 %v1555_v40, %v261_v4 }
 0x14a   :  { %v683_v9 = vsel %vm661_vm4, %v1505_v8, -inf  ;;  %941 = vmatpush.msra.mxu3 %v262_v5 }
 0x14b   :  { %684 = vmax.xlane.f32.xlu0 %v683_v9  ;;  %678 = vmax.xlane.f32.xlu2 %v677_v10 }
 0x186   :  { %v664_v13 = vpop.xlane.xlu1 %663 }
 0x187   :  { %v686_v15 = vsub.f32 %v477_v41, %v664_v13 }
 0x189   :  { %v694_v16 = vmul.f32 1.442695, %v686_v15 }
 0x18b   :  { %1121 = vpow2.f32 %v694_v16  ;;  %v264_v16 = vpop.f32.mrf.mxu2 }
 0x18e   :  { %v667_v18 = vpop.xlane.xlu2 %666 }
 0x18f   :  { %v687_v23 = vsub.f32 %v1460_v45, %v667_v18  ;;  %v265_v18 = vadd.f32 %v1555_v40, %v264_v16 }
 0x191   :  { %v1519_v19 = vpop.eup %1121  ;;  %v696_v26 = vmul.f32 1.442695, %v687_v23  ;;  %964 = vmatpush.msra.mxu0 %v265_v18 }
 0x192   :  { %v710_v21 = vsel %vm661_vm4, %v1519_v19, 0.0 }
 0x193   :  { %711 = vadd.xlane.f32.xlu2 %v710_v21 }
 0x196   :  { %v670_v22 = vpop.xlane.xlu2 %669 }
 0x197   :  { %v688_v11 = vsub.f32 %v529_v49, %v670_v22  ;;  %v256_v49 = vadd.f32 %v1555_v40, %v255_v48 }
 0x199   :  { %v698_v24 = vmul.f32 1.442695, %v688_v11  ;;  %895 = vmatpush.msrb.mxu1 %v256_v49 }
 0x19b   :  { %1123 = vpow2.f32 %v698_v24  ;;  %v267_v24 = vpop.f32.mrf.mxu2 }
 0x19c   :  { %1125 = vpow2.f32 %v696_v26  ;;  %v268_v25 = vadd.f32 %v1555_v40, %v267_v24 }
 0x19e   :  { %v673_v27 = vpop.xlane.xlu0 %672  ;;  %987 = vmatpush.msra.mxu1 %v268_v25 }
 0x19f   :  { %v689_v14 = vsub.f32 %v555_v53, %v673_v27 }
 0x1a1   :  { %v1532_v28 = vpop.eup %1123  ;;  %v700_v29 = vmul.f32 1.442695, %v689_v14 }
 0x1a2   :  { %v716_v30 = vsel %vm661_vm4, %v1532_v28, 0.0  ;;  %v1540_v34 = vpop.eup %1125 }
 0x1a3   :  { %1127 = vpow2.f32 %v700_v29  ;;  %717 = vadd.xlane.f32.xlu0 %v716_v30  ;;  %v713_v38 = vsel %vm661_vm4, %v1540_v34, 0.0 }
 0x1a6   :  { %v676_v33 = vpop.xlane.xlu1 %675 }
 0x1a7   :  { %v690_v32 = vsub.f32 %v581_v60, %v676_v33 }
 0x1a9   :  { %v1542_v35 = vpop.eup %1127  ;;  %v702_v36 = vmul.f32 1.442695, %v690_v32 }
 0x1aa   :  { %v719_v39 = vsel %vm661_vm4, %v1542_v35, 0.0 }
 0x1ab   :  { %1129 = vpow2.f32 %v702_v36  ;;  %714 = vadd.xlane.f32.xlu0 %v713_v38  ;;  %720 = vadd.xlane.f32.xlu1 %v719_v39 }
 0x1b1   :  { %v1557_v41 = vpop.eup %1129 }
 0x1b2   :  { %v722_v42 = vsel %vm661_vm4, %v1557_v41, 0.0 }
 0x1b3   :  { %723 = vadd.xlane.f32.xlu0 %v722_v42  ;;  %v270_v42 = vpop.f32.mrf.mxu2 }
 0x1b6   :  { %v682_v45 = vpop.xlane.xlu2 %681 }
 0x1b7   :  { %v692_v46 = vsub.f32 %v1493_v2, %v682_v45 }
 0x1b9   :  { %v706_v47 = vmul.f32 1.442695, %v692_v46  ;;  %v271_v46 = vadd.f32 %v1555_v40, %v270_v42 }
 0x1bb   :  { %1131 = vpow2.f32 %v706_v47  ;;  %1010 = vmatpush.msra.mxu2 %v271_v46 }
 0x1be   :  { %v685_v50 = vpop.xlane.xlu0 %684  ;;  %v679_v51 = vpop.xlane.xlu2 %678 }
 0x1bf   :  { %v693_v52 = vsub.f32 %v1505_v8, %v685_v50  ;;  %v691_v53 = vsub.f32 %v1503_v6, %v679_v51 }
 0x1c1   :  { %v1566_v54 = vpop.eup %1131  ;;  %v708_v55 = vmul.f32 1.442695, %v693_v52  ;;  %v704_v56 = vmul.f32 1.442695, %v691_v53 }
 0x1c2   :  { %v728_v57 = vsel %vm661_vm4, %v1566_v54, 0.0 }
 0x1c3   :  { %1133 = vpow2.f32 %v708_v55  ;;  %729 = vadd.xlane.f32.xlu1 %v728_v57 }
 0x1c4   :  { %1135 = vpow2.f32 %v704_v56 }
 0x1c9   :  { %v1570_v58 = vpop.eup %1133 }
 0x1ca   :  { %v1572_v59 = vpop.eup %1135  ;;  %v731_v60 = vsel %vm661_vm4, %v1570_v58, 0.0 }
 0x1cb   :  { %v725_v61 = vsel %vm661_vm4, %v1572_v59, 0.0  ;;  %732 = vadd.xlane.f32.xlu2 %v731_v60 }
 0x1cc   :  { %726 = vadd.xlane.f32.xlu1 %v725_v61 }
 0x206   :  { %v712_v0 = vpop.xlane.xlu2 %711 }
 0x207   :  { %1137 = vrcp.f32 %v712_v0  ;;  %v745_v7 = vand.u32 2147483648, %v712_v0  ;;  %v743_v8 = vand.u32 2147483647, %v712_v0  ;;  %vm739_vm5 = vweird.f32 %v712_v0 }
 0x209   :  { %v746_v10 = vor.u32 1.1754944e-38, %v745_v7  ;;  %vm744_vm7 = vcmp.eq.f32.partialorder %v743_v8, 8.507059e+37 }
 0x20d   :  { %v1138_v1 = vpop.eup %1137 }
 0x20e   :  { %v735_v2 = vmul.f32 %v1138_v1, %v712_v0  ;;  %vm740_vm0 = vweird.f32 %v1138_v1 }
 0x20f   :  { %vm741_vm6 = vmor %vm739_vm5, %vm740_vm0 }
 0x210   :  { %v736_v3 = vsub.f32 1.0, %v735_v2  ;;  %v273_v2 = vpop.f32.mrf.mxu2 }
 0x211   :  { %v274_v5 = vadd.f32 %v1555_v40, %v273_v2 }
 0x212   :  { %v737_v6 = vmul.f32 %v1138_v1, %v736_v3 }
 0x213   :  { %1033 = vmatpush.msrb.mxu3 %v274_v5 }
 0x214   :  { %v738_v9 = vadd.f32 %v1138_v1, %v737_v6 }
 0x216   :  { %v718_v12 = vpop.xlane.xlu0 %717  ;;  %v742_v13 = vsel %vm741_vm6, %v1138_v1, %v738_v9 }
 0x217   :  { %1139 = vrcp.f32 %v718_v12  ;;  %v747_v15 = vsel %vm744_vm7, %v746_v10, %v742_v13  ;;  %v773_v27 = vand.u32 2147483648, %v718_v12  ;;  %v771_v14 = vand.u32 2147483647, %v718_v12 }
 0x218   :  { %v846_v17 = vmul.f32 %v1519_v19, %v747_v15  ;;  %vm767_vm9 = vweird.f32 %v718_v12 }
 0x219   :  { %v774_v31 = vor.u32 1.1754944e-38, %v773_v27  ;;  %vm772_vm11 = vcmp.eq.f32.partialorder %v771_v14, 8.507059e+37 }
 0x21a   :  { %1090 = vmatmul.msk.f32.vlgmr.msrb.gmra.mxu0 %vm661_vm4, %v846_v17 }
 0x21d   :  { %v1140_v20 = vpop.eup %1139 }
 0x21e   :  { %v763_v21 = vmul.f32 %v1140_v20, %v718_v12  ;;  %v715_v22 = vpop.xlane.xlu0 %714  ;;  %v721_v11 = vpop.xlane.xlu1 %720  ;;  %vm768_vm8 = vweird.f32 %v1140_v20 }
 0x21f   :  { %1141 = vrcp.f32 %v715_v22  ;;  %vm769_vm10 = vmor %vm767_vm9, %vm768_vm8  ;;  %v759_v43 = vand.u32 2147483648, %v715_v22  ;;  %v757_v48 = vand.u32 2147483647, %v715_v22  ;;  %v787_v49 = vand.u32 2147483648, %v721_v11 }
 0x220   :  { %v764_v23 = vsub.f32 1.0, %v763_v21  ;;  %1143 = vrcp.f32 %v721_v11  ;;  %v785_v51 = vand.u32 2147483647, %v721_v11  ;;  %vm753_vm14 = vweird.f32 %v715_v22 }
 0x221   :  { %v760_v55 = vor.u32 1.1754944e-38, %v759_v43  ;;  %vm781_vm1 = vweird.f32 %v721_v11  ;;  %vm758_vm2 = vcmp.eq.f32.partialorder %v757_v48, 8.507059e+37 }
 0x222   :  { %v765_v26 = vmul.f32 %v1140_v20, %v764_v23  ;;  %vm786_vm5 = vcmp.eq.f32.partialorder %v785_v51, 8.507059e+37 }
 0x224   :  { %v766_v19 = vadd.f32 %v1140_v20, %v765_v26 }
 0x225   :  { %v1142_v29 = vpop.eup %1141 }
 0x226   :  { %v1144_v30 = vpop.eup %1143  ;;  %v749_v33 = vmul.f32 %v1142_v29, %v715_v22  ;;  %v724_v32 = vpop.xlane.xlu0 %723  ;;  %v770_v36 = vsel %vm769_vm10, %v1140_v20, %v766_v19  ;;  %vm754_vm12 = vweird.f32 %v1142_v29 }
 0x227   :  { %v777_v37 = vmul.f32 %v1144_v30, %v721_v11  ;;  %1145 = vrcp.f32 %v724_v32  ;;  %v775_v39 = vsel %vm772_vm11, %v774_v31, %v770_v36  ;;  %vm782_vm13 = vweird.f32 %v1144_v30  ;;  %vm755_vm15 = vmor %vm753_vm14, %vm754_vm12 }
 0x228   :  { %v750_v38 = vsub.f32 1.0, %v749_v33  ;;  %v848_v45 = vmul.f32 %v1532_v28, %v775_v39  ;;  %vm783_vm0 = vmor %vm781_vm1, %vm782_vm13  ;;  %v788_v28 = vor.u32 1.1754944e-38, %v787_v49  ;;  %v801_v3 = vand.u32 2147483648, %v724_v32 }
 0x229   :  { %v778_v44 = vsub.f32 1.0, %v777_v37  ;;  %v799_v7 = vand.u32 2147483647, %v724_v32  ;;  %vm795_vm7 = vweird.f32 %v724_v32 }
 0x22a   :  { %v751_v47 = vmul.f32 %v1142_v29, %v750_v38  ;;  %1092 = vmatmul.msk.f32.vlgmr.msrb.gmra.mxu2 %vm661_vm4, %v848_v45  ;;  %v802_v9 = vor.u32 1.1754944e-38, %v801_v3 }
 0x22b   :  { %v779_v50 = vmul.f32 %v1144_v30, %v778_v44  ;;  %vm800_vm9 = vcmp.eq.f32.partialorder %v799_v7, 8.507059e+37 }
 0x22c   :  { %v752_v52 = vadd.f32 %v1142_v29, %v751_v47 }
 0x22d   :  { %v1146_v53 = vpop.eup %1145  ;;  %v780_v56 = vadd.f32 %v1144_v30, %v779_v50 }
 0x22e   :  { %v791_v57 = vmul.f32 %v1146_v53, %v724_v32  ;;  %v756_v60 = vsel %vm755_vm15, %v1142_v29, %v752_v52  ;;  %vm796_vm6 = vweird.f32 %v1146_v53 }
 0x22f   :  { %v784_v61 = vsel %vm783_vm0, %v1144_v30, %v780_v56  ;;  %v761_v62 = vsel %vm758_vm2, %v760_v55, %v756_v60  ;;  %vm797_vm8 = vmor %vm795_vm7, %vm796_vm6 }
 0x230   :  { %v789_v63 = vsel %vm786_vm5, %v788_v28, %v784_v61  ;;  %v792_v0 = vsub.f32 1.0, %v791_v57  ;;  %v847_v1 = vmul.f32 %v1540_v34, %v761_v62 }
 0x231   :  { %v849_v4 = vmul.f32 %v1542_v35, %v789_v63 }
 0x232   :  { %v793_v6 = vmul.f32 %v1146_v53, %v792_v0  ;;  %1091 = vmatmul.msk.f32.vlgmr.msrb.gmra.mxu1 %vm661_vm4, %v847_v1 }
 0x233   :  { %1093 = vmatmul.msk.f32.vlgmr.msra.gmra.mxu3 %vm661_vm4, %v849_v4 }
 0x234   :  { %v794_v8 = vadd.f32 %v1146_v53, %v793_v6 }
 0x236   :  { %v798_v10 = vsel %vm797_vm8, %v1146_v53, %v794_v8  ;;  %v730_v34 = vpop.xlane.xlu1 %729 }
 0x237   :  { %v803_v12 = vsel %vm800_vm9, %v802_v9, %v798_v10  ;;  %1147 = vrcp.f32 %v730_v34  ;;  %v829_v18 = vand.u32 2147483648, %v730_v34  ;;  %v827_v21 = vand.u32 2147483647, %v730_v34 }
 0x238   :  { %v850_v35 = vmul.f32 %v1557_v41, %v803_v12  ;;  %vm823_vm11 = vweird.f32 %v730_v34 }
 0x239   :  { %v830_v23 = vor.u32 1.1754944e-38, %v829_v18  ;;  %vm828_vm13 = vcmp.eq.f32.partialorder %v827_v21, 8.507059e+37 }
 0x23a   :  { %1094 = vmatmul.msk.f32.vlgmr.msra.gmra.mxu0 %vm661_vm4, %v850_v35 }
 0x23d   :  { %v1148_v40 = vpop.eup %1147 }
 0x23e   :  { %v819_v13 = vmul.f32 %v1148_v40, %v730_v34  ;;  %v733_v15 = vpop.xlane.xlu2 %732  ;;  %vm824_vm10 = vweird.f32 %v1148_v40 }
 0x23f   :  { %1149 = vrcp.f32 %v733_v15  ;;  %v727_v16 = vpop.xlane.xlu1 %726  ;;  %vm825_vm12 = vmor %vm823_vm11, %vm824_vm10  ;;  %v843_v29 = vand.u32 2147483648, %v733_v15  ;;  %v841_v33 = vand.u32 2147483647, %v733_v15  ;;  %vm837_vm1 = vweird.f32 %v733_v15 }
 0x240   :  { %v820_v17 = vsub.f32 1.0, %v819_v13  ;;  %1151 = vrcp.f32 %v727_v16  ;;  %v815_v32 = vand.u32 2147483648, %v727_v16  ;;  %v813_v37 = vand.u32 2147483647, %v727_v16 }
 0x241   :  { %v844_v39 = vor.u32 1.1754944e-38, %v843_v29  ;;  %vm809_vm0 = vweird.f32 %v727_v16  ;;  %vm842_vm5 = vcmp.eq.f32.partialorder %v841_v33, 8.507059e+37 }
 0x242   :  { %v821_v20 = vmul.f32 %v1148_v40, %v820_v17  ;;  %vm814_vm7 = vcmp.eq.f32.partialorder %v813_v37, 8.507059e+37 }
 0x244   :  { %v822_v22 = vadd.f32 %v1148_v40, %v821_v20 }
 0x245   :  { %v1150_v11 = vpop.eup %1149 }
 0x246   :  { %v1152_v24 = vpop.eup %1151  ;;  %v826_v41 = vsel %vm825_vm12, %v1148_v40, %v822_v22  ;;  %v833_v25 = vmul.f32 %v1150_v11, %v733_v15  ;;  %vm838_vm14 = vweird.f32 %v1150_v11 }
 0x247   :  { %v831_v26 = vsel %vm828_vm13, %v830_v23, %v826_v41  ;;  %v805_v27 = vmul.f32 %v1152_v24, %v727_v16  ;;  %vm810_vm15 = vweird.f32 %v1152_v24  ;;  %vm839_vm2 = vmor %vm837_vm1, %vm838_vm14 }
 0x248   :  { %v834_v14 = vsub.f32 1.0, %v833_v25  ;;  %v852_v19 = vmul.f32 %v1566_v54, %v831_v26  ;;  %vm811_vm6 = vmor %vm809_vm0, %vm810_vm15  ;;  %v816_v54 = vor.u32 1.1754944e-38, %v815_v32 }
 0x249   :  { %v806_v30 = vsub.f32 1.0, %v805_v27 }
 0x24a   :  { %v835_v31 = vmul.f32 %v1150_v11, %v834_v14  ;;  %1096 = vmatmul.msk.f32.vlgmr.msra.gmra.mxu2 %vm661_vm4, %v852_v19 }
 0x24b   :  { %v807_v36 = vmul.f32 %v1152_v24, %v806_v30 }
 0x24c   :  { %v836_v38 = vadd.f32 %v1150_v11, %v835_v31 }
 0x24d   :  { %v808_v42 = vadd.f32 %v1152_v24, %v807_v36 }
 0x24e   :  { %v840_v43 = vsel %vm839_vm2, %v1150_v11, %v836_v38 }
 0x24f   :  { %v845_v44 = vsel %vm842_vm5, %v844_v39, %v840_v43  ;;  %v812_v45 = vsel %vm811_vm6, %v1152_v24, %v808_v42 }
 0x250   :  { %v853_v46 = vmul.f32 %v1570_v58, %v845_v44  ;;  %v817_v47 = vsel %vm814_vm7, %v816_v54, %v812_v45 }
 0x251   :  { %v851_v48 = vmul.f32 %v1572_v59, %v817_v47 }
 0x252   :  { %1097 = vmatmul.msk.f32.vlgmr.msrb.gmra.mxu3 %vm661_vm4, %v853_v46 }
 0x253   :  { %1095 = vmatmul.msk.f32.vlgmr.msra.gmra.mxu1 %vm661_vm4, %v851_v48 }
 0x297   :  { %v874_v49 = vpop.f32.mrf.mxu0 }
 0x298   :  { %1038 = vst.msk [vmem:[%s1643_s11] sm:$0xff] %vm452_vm3, %v874_v49 }
 0x2ad   :  { %v920_v50 = vpop.f32.mrf.mxu2 }
 0x2ae   :  { %1040 = vst.msk [vmem:[%s1643_s11 + $0x10] sm:$0xff] %vm452_vm3, %v920_v50 }
 0x2af   :  { %v897_v58 = vpop.f32.mrf.mxu1 }
 0x2b0   :  { %1039 = vst.msk [vmem:[%s1643_s11 + $0x8] sm:$0xff] %vm452_vm3, %v897_v58 }
 0x2b6   :  { %v943_v59 = vpop.f32.mrf.mxu3 }
 0x2b7   :  { %1041 = vst.msk [vmem:[%s1643_s11 + $0x18] sm:$0xff] %vm452_vm3, %v943_v59  ;;  %v966_v51 = vpop.f32.mrf.mxu0 }
 0x2b8   :  { %1042 = vst.msk [vmem:[%s1643_s11 + $0x20] sm:$0xff] %vm452_vm3, %v966_v51 }
 0x2cd   :  { %v1012_v52 = vpop.f32.mrf.mxu2 }
 0x2ce   :  { %1044 = vst.msk [vmem:[%s1643_s11 + $0x30] sm:$0xff] %vm452_vm3, %v1012_v52 }
 0x2d0   :  { %v989_v53 = vpop.f32.mrf.mxu1 }
 0x2d1   :  { %1043 = vst.msk [vmem:[%s1643_s11 + $0x28] sm:$0xff] %vm452_vm3, %v989_v53 }
 0x2d5   :  { %v1035_v55 = vpop.f32.mrf.mxu3 }
 0x2d6   :  { %1045 = vst.msk [vmem:[%s1643_s11 + $0x38] sm:$0xff] %vm452_vm3, %v1035_v55 }

</bundles_post_ra>
